<compile_context>
chip_gen: v7x
topology: tpu7x:2x2x1
jax: 0.10.0
libtpu: 0.0.40
codegen_flags: <defaults>
</compile_context>

<pallas_src>
import jax
import jax.numpy as jnp
from jax.experimental import pallas as pl
from jax.experimental.pallas import tpu as pltpu

_LANES = 128


def _round_up(x, m):
    return (x + m - 1) // m * m


def _stats_kernel(x_ref, wT_ref, sum_ref, sq_ref):
    """Accumulate per-feature sum(z) and sum(z*z) with z = x @ W^T (bias-free)."""
    @pl.when(pl.program_id(0) == 0)
    def _():
        sum_ref[...] = jnp.zeros_like(sum_ref)
        sq_ref[...] = jnp.zeros_like(sq_ref)

    z = jnp.dot(x_ref[...], wT_ref[...], preferred_element_type=jnp.float32)
    sum_ref[...] += jnp.sum(z, axis=0, keepdims=True)
    sq_ref[...] += jnp.sum(z * z, axis=0, keepdims=True)


def _normalize_kernel(x_ref, wT_ref, a_ref, c_ref, out_ref):
    """out = relu(z * a + c) with z = x @ W^T (fused BN affine + ReLU)."""
    z = jnp.dot(x_ref[...], wT_ref[...], preferred_element_type=jnp.float32)
    out_ref[...] = jnp.maximum(z * a_ref[...] + c_ref[...], 0.0).astype(out_ref.dtype)


def predictor_forward(state, action, weight, bias, gamma, beta, *,
                      eps=1e-5, block_rows=512, compute_dtype=jnp.bfloat16):
    """state: (B, T, s_dim) or (N, s_dim); action: (B, T, 2) or (N, 2)."""
    orig_shape = state.shape
    if state.ndim == 3:
        B, T, s_dim = state.shape
        state = state.reshape(B * T, s_dim)
        action = action.reshape(B * T, -1)
    else:
        s_dim = state.shape[1]
    N = state.shape[0]
    a_dim = action.shape[1]
    in_dim = s_dim + a_dim

    f_in = _round_up(in_dim, _LANES)       # padded input-feature (lane) width
    f_out = _round_up(s_dim, _LANES)       # padded output-feature (lane) width

    tm = min(block_rows, _round_up(N, 8))  # row tile (sublane multiple of 8)
    n_pad = _round_up(N, tm)
    n_tiles = n_pad // tm

    # Padded input slab [state | action | 0] and padded transposed weight.
    x = jnp.concatenate([state.astype(jnp.float32),
                         action.astype(jnp.float32)], axis=1)
    x_pad = jnp.pad(x, ((0, n_pad - N), (0, f_in - in_dim)))
    wT_pad = jnp.pad(weight.astype(jnp.float32).T,
                     ((0, f_in - in_dim), (0, f_out - s_dim)))

    x_lo = x_pad.astype(compute_dtype)     # bf16 HBM stream / MXU operand
    wT_lo = wT_pad.astype(compute_dtype)

    x_spec = pl.BlockSpec((tm, f_in), lambda i: (i, 0))
    w_spec = pl.BlockSpec((f_in, f_out), lambda i: (0, 0))
    vec_spec = pl.BlockSpec((1, f_out), lambda i: (0, 0))

    # ---- Pass 1: batch statistics of z = x @ W^T, accumulated over row tiles.
    sum_z, sq_z = pl.pallas_call(
        _stats_kernel,
        out_shape=(jax.ShapeDtypeStruct((1, f_out), jnp.float32),
                   jax.ShapeDtypeStruct((1, f_out), jnp.float32)),
        grid=(n_tiles,),
        in_specs=[x_spec, w_spec],
        out_specs=(vec_spec, vec_spec),
        compiler_params=pltpu.CompilerParams(
            dimension_semantics=("arbitrary",)),
    )(x_lo, wT_lo)

    # ---- Tiny (1, f_out) wrapper math: fold bias/BN/affine into scale + shift.
    # With y = z + bias, training-mode BN gives (y - mean_y) = (z - mean_z),
    # so the Linear bias cancels exactly; `bias` is intentionally unused.
    mean_z = sum_z / N
    var_z = jnp.maximum(sq_z / N - mean_z * mean_z, 0.0)   # biased batch variance
    inv_std = jax.lax.rsqrt(var_z + eps)
    gamma_p = jnp.pad(gamma.astype(jnp.float32), (0, f_out - s_dim)).reshape(1, f_out)
    beta_p = jnp.pad(beta.astype(jnp.float32), (0, f_out - s_dim)).reshape(1, f_out)
    a = gamma_p * inv_std
    c = beta_p - a * mean_z

    # ---- Pass 2: out = relu(z * a + c); row tiles independent -> "parallel".
    out_pad = pl.pallas_call(
        _normalize_kernel,
        out_shape=jax.ShapeDtypeStruct((n_pad, f_out), jnp.float32),
        grid=(n_tiles,),
        in_specs=[x_spec, w_spec, vec_spec, vec_spec],
        out_specs=pl.BlockSpec((tm, f_out), lambda i: (i, 0)),
        compiler_params=pltpu.CompilerParams(
            dimension_semantics=("parallel",)),
    )(x_lo, wT_lo, a, c)

    out = out_pad[:N, :s_dim]
    if len(orig_shape) == 3:
        out = out.reshape(orig_shape)
    return out


def reference_forward(state, action, weight, bias, gamma, beta, eps=1e-5):
    """Pure-JAX f32 reference mirroring the PyTorch module (training-mode BN)."""
    orig_shape = state.shape
    if state.ndim == 3:
        B, T, s_dim = state.shape
        state = state.reshape(B * T, s_dim)
        action = action.reshape(B * T, -1)
    x = jnp.concatenate([state, action], axis=1)
    y = x @ weight.T + bias
    mean = y.mean(axis=0, keepdims=True)
    var = ((y - mean) ** 2).mean(axis=0, keepdims=True)
    y = (y - mean) / jnp.sqrt(var + eps)
    y = jnp.maximum(gamma * y + beta, 0.0)
    if len(orig_shape) == 3:
        y = y.reshape(orig_shape)
    return y


def reference_forward_matched(state, action, weight, bias, gamma, beta, eps=1e-5,
                              compute_dtype=jnp.bfloat16):
    """Reference with inputs/weights rounded to the kernel's MXU compute dtype."""
    rd = lambda t: t.astype(compute_dtype).astype(jnp.float32)
    return reference_forward(rd(state), rd(action), rd(weight), bias, gamma, beta, eps)


if __name__ == "__main__":
    B, T, s_dim = 2, 8, 32
    key = jax.random.PRNGKey(0)
    k1, k2, k3, k4 = jax.random.split(key, 4)

    state = jax.random.normal(k1, (B, T, s_dim), dtype=jnp.float32)
    action = jax.random.normal(k2, (B, T, 2), dtype=jnp.float32)

    # Deterministic parameter init (PyTorch-Linear-style uniform bounds).
    fan_in = s_dim + 2
    bound = 1.0 / jnp.sqrt(fan_in)
    weight = jax.random.uniform(k3, (s_dim, fan_in), minval=-bound, maxval=bound,
                                dtype=jnp.float32)
    bias = jax.random.uniform(k4, (s_dim,), minval=-bound, maxval=bound,
                              dtype=jnp.float32)
    gamma = jnp.ones((s_dim,), jnp.float32)   # BatchNorm1d weight init
    beta = jnp.zeros((s_dim,), jnp.float32)   # BatchNorm1d bias init

    out = predictor_forward(state, action, weight, bias, gamma, beta)
    out = jax.block_until_ready(out)
    assert out.shape == (B, T, s_dim)

    # Tight check against a reference with matching (bf16) input rounding.
    ref_m = reference_forward_matched(state, action, weight, bias, gamma, beta)
    assert jnp.allclose(out, ref_m, atol=2e-3, rtol=2e-3), "mismatch vs matched ref"

    # Loose sanity check against the pure-f32 reference (bf16 input rounding).
    ref = reference_forward(state, action, weight, bias, gamma, beta)
    assert jnp.allclose(out, ref, atol=5e-2, rtol=0.0), "mismatch vs f32 ref"

    print("KERNEL_OK")
</pallas_src>

<mosaic_0001>
module attributes {stable_mosaic.version = 11 : i64} {
  func.func @_stats_kernel(%arg0: i32, %arg1: memref<16x128xbf16, #tpu.memory_space<vmem>>, %arg2: memref<128x128xbf16, #tpu.memory_space<vmem>>, %arg3: memref<1x128xf32, #tpu.memory_space<vmem>>, %arg4: memref<1x128xf32, #tpu.memory_space<vmem>>) attributes {dimension_semantics = [#tpu.dimension_semantics<arbitrary>], iteration_bounds = array<i64: 1>, scalar_prefetch = 0 : i64, scratch_operands = 0 : i64, tpu.core_type = #tpu.core_type<tc>, window_params = [{transform_indices = @transform_0, window_bounds = array<i64: 16, 128>}, {pipeline_mode = #tpu.pipeline_mode<synchronous>, transform_indices = @transform_1, window_bounds = array<i64: 128, 128>}, {pipeline_mode = #tpu.pipeline_mode<synchronous>, transform_indices = @transform_2, window_bounds = array<i64: 1, 128>}, {pipeline_mode = #tpu.pipeline_mode<synchronous>, transform_indices = @transform_3, window_bounds = array<i64: 1, 128>}]} {
    %c0_i32 = arith.constant 0 : i32
    %0 = arith.cmpi eq, %arg0, %c0_i32 : i32
    %1 = arith.extui %0 : i1 to i32
    %c0_i32_0 = arith.constant 0 : i32
    %2 = arith.cmpi ne, %1, %c0_i32_0 : i32
    scf.if %2 {
      %cst_14 = arith.constant 0.000000e+00 : f32
      %17 = vector.broadcast %cst_14 : f32 to vector<1x128xf32>
      %c0_15 = arith.constant 0 : index
      %c0_16 = arith.constant 0 : index
      %18 = vector.load %arg3[%c0_15, %c0_16] : memref<1x128xf32, #tpu.memory_space<vmem>>, vector<1x128xf32>
      tpu.vector_store %arg3[%c0_15, %c0_16], %17 {strides = array<i32>} : memref<1x128xf32, #tpu.memory_space<vmem>>, vector<1x128xf32>,
      %cst_17 = arith.constant 0.000000e+00 : f32
      %19 = vector.broadcast %cst_17 : f32 to vector<1x128xf32>
      %c0_18 = arith.constant 0 : index
      %c0_19 = arith.constant 0 : index
      %20 = vector.load %arg4[%c0_18, %c0_19] : memref<1x128xf32, #tpu.memory_space<vmem>>, vector<1x128xf32>
      tpu.vector_store %arg4[%c0_18, %c0_19], %19 {strides = array<i32>} : memref<1x128xf32, #tpu.memory_space<vmem>>, vector<1x128xf32>,
    } else {
    }
    %c0 = arith.constant 0 : index
    %c0_1 = arith.constant 0 : index
    %3 = vector.load %arg1[%c0, %c0_1] : memref<16x128xbf16, #tpu.memory_space<vmem>>, vector<16x128xbf16>
    %c0_2 = arith.constant 0 : index
    %c0_3 = arith.constant 0 : index
    %4 = vector.load %arg2[%c0_2, %c0_3] : memref<128x128xbf16, #tpu.memory_space<vmem>>, vector<128x128xbf16>
    %cst = arith.constant dense<0.000000e+00> : vector<16x128xf32>
    %5 = tpu.matmul %3, %4, %cst {dimension_numbers = #tpu.dot_dimension_numbers<[1], [0], [0], [1], [0, 0, 1, 1], [], []>} : vector<16x128xbf16>, vector<128x128xbf16>, vector<16x128xf32> -> vector<16x128xf32>
    %c0_4 = arith.constant 0 : index
    %c0_5 = arith.constant 0 : index
    %6 = vector.load %arg3[%c0_4, %c0_5] : memref<1x128xf32, #tpu.memory_space<vmem>>, vector<1x128xf32>
    %cst_6 = arith.constant dense<0.000000e+00> : vector<128xf32>
    %7 = vector.multi_reduction <add>, %5, %cst_6 [0] : vector<16x128xf32> to vector<128xf32>
    %8 = vector.shape_cast %7 : vector<128xf32> to vector<1x128xf32>
    %9 = arith.addf %6, %8 : vector<1x128xf32>
    %c0_7 = arith.constant 0 : index
    %c0_8 = arith.constant 0 : index
    %10 = vector.load %arg3[%c0_7, %c0_8] : memref<1x128xf32, #tpu.memory_space<vmem>>, vector<1x128xf32>
    tpu.vector_store %arg3[%c0_7, %c0_8], %9 {strides = array<i32>} : memref<1x128xf32, #tpu.memory_space<vmem>>, vector<1x128xf32>,
    %c0_9 = arith.constant 0 : index
    %c0_10 = arith.constant 0 : index
    %11 = vector.load %arg4[%c0_9, %c0_10] : memref<1x128xf32, #tpu.memory_space<vmem>>, vector<1x128xf32>
    %12 = arith.mulf %5, %5 : vector<16x128xf32>
    %cst_11 = arith.constant dense<0.000000e+00> : vector<128xf32>
    %13 = vector.multi_reduction <add>, %12, %cst_11 [0] : vector<16x128xf32> to vector<128xf32>
    %14 = vector.shape_cast %13 : vector<128xf32> to vector<1x128xf32>
    %15 = arith.addf %11, %14 : vector<1x128xf32>
    %c0_12 = arith.constant 0 : index
    %c0_13 = arith.constant 0 : index
    %16 = vector.load %arg4[%c0_12, %c0_13] : memref<1x128xf32, #tpu.memory_space<vmem>>, vector<1x128xf32>
    tpu.vector_store %arg4[%c0_12, %c0_13], %15 {strides = array<i32>} : memref<1x128xf32, #tpu.memory_space<vmem>>, vector<1x128xf32>,
    return
  }
  func.func @transform_0(%arg0: i32) -> (i32, i32) {
    %c0_i32 = arith.constant 0 : i32
    %c0_i32_0 = arith.constant 0 : i32
    return %arg0, %c0_i32 : i32, i32
  }
  func.func @transform_1(%arg0: i32) -> (i32, i32) {
    %c0_i32 = arith.constant 0 : i32
    %c0_i32_0 = arith.constant 0 : i32
    %c0_i32_1 = arith.constant 0 : i32
    return %c0_i32, %c0_i32_0 : i32, i32
  }
  func.func @transform_2(%arg0: i32) -> (i32, i32) {
    %c0_i32 = arith.constant 0 : i32
    %c0_i32_0 = arith.constant 0 : i32
    %c0_i32_1 = arith.constant 0 : i32
    return %c0_i32, %c0_i32_0 : i32, i32
  }
  func.func @transform_3(%arg0: i32) -> (i32, i32) {
    %c0_i32 = arith.constant 0 : i32
    %c0_i32_0 = arith.constant 0 : i32
    %c0_i32_1 = arith.constant 0 : i32
    return %c0_i32, %c0_i32_0 : i32, i32
  }
}

</mosaic_0001>

<bundles_post_ra>
// kernel: tpu_custom_call.1
= control target key start
LH: loop header
LB: loop body
LE: loop exit
PB: predicated region body
PF: predicated region fallthrough
CT: control target
= control target key end

     0   :  { %9 = vsyncpa [#allocation3], 0  ;;  %s450_s0 = inlined_call_operand.hbm [shape: bf16[16,128], index: 0, kind: input, shape index: {}]   ;;  %s451_s1 = inlined_call_operand.hbm [shape: bf16[128,128], index: 1, kind: input, shape index: {}]   ;;  %s452_s2 = inlined_call_operand.hbm [shape: f32[1,128], index: 2, kind: output, shape index: {0}]   ;;  %s453_s3 = inlined_call_operand.hbm [shape: f32[1,128], index: 3, kind: output, shape index: {1}]  }
   0x1   :  { %10 = vsyncpa [#allocation6], 0 }
   0x2   :  { %11 = vsyncpa [#allocation4], 0 }
   0x3   :  { %12 = vsyncpa [#allocation9], 0  ;;  %s366_s12 = smov [#allocation2]   ;;  %s270_s16 = scalar_lea.hbm %s450_s0, 128 }
   0x4   :  { %s18_s13 = sshll.u32 %s366_s12, 4  ;;  %p271_p0 = scmp.ne.s32.totalorder %s450_s0, %s270_s16  ;;  %s19_s13 = int_to_ptr.vmem [resolvable:$true] %s18_s13 }
   0x5   :  { %p274_p1 = scmp.lt.u32.totalorder %s270_s16, %s450_s0 }
   0x7   :  { %p276_p2 = pnand %p274_p1, %p271_p0 }
   0x9   :  { %279 = shalt.err (!%p276_p2)
}
   0xa   :  { %s280_s21 = scalar_lea.vmem %s19_s13, 128  ;;  %p285_p4 = scmp.lt.s32.totalorder %s19_s13, %s19_s13 }
   0xb   :  { %p281_p3 = scmp.ne.s32.totalorder %s19_s13, %s280_s21  ;;  %p286_p5 = scmp.lt.s32.totalorder %s280_s21, %s280_s21 }
   0xd   :  { %p287_p6 = por %p286_p5, %p285_p4 }
   0xf   :  { %p288_p7 = pnand %p287_p6, %p281_p3 }
  0x11   :  { %291 = shalt.err (!%p288_p7)
}
  0x12   :  { %s367_s22 = smov 64   ;;  %s368_s23 = smov 4  }
  0x13   :  { %24 = dma.hbm_to_vmem [thread:$0]  %s450_s0, 128, %s19_s13, [#allocation3], %s367_s22, %s367_s22, %s368_s23  }
  0x14   :  { %s369_s26 = smov [#allocation5]   ;;  %s292_s30 = scalar_lea.hbm %s451_s1, 1024 }
  0x15   :  { %s30_s27 = sshll.u32 %s369_s26, 4  ;;  %p293_p8 = scmp.ne.s32.totalorder %s451_s1, %s292_s30  ;;  %s31_s27 = int_to_ptr.vmem [resolvable:$true] %s30_s27 }
  0x16   :  { %p296_p9 = scmp.lt.u32.totalorder %s292_s30, %s451_s1 }
  0x18   :  { %p298_p10 = pnand %p296_p9, %p293_p8 }
  0x1a   :  { %301 = shalt.err (!%p298_p10)
}
  0x1b   :  { %s302_s8 = scalar_lea.vmem %s31_s27, 1024  ;;  %p307_p12 = scmp.lt.s32.totalorder %s31_s27, %s31_s27 }
  0x1c   :  { %p303_p11 = scmp.ne.s32.totalorder %s31_s27, %s302_s8  ;;  %p308_p13 = scmp.lt.s32.totalorder %s302_s8, %s302_s8 }
  0x1e   :  { %p309_p0 = por %p308_p13, %p307_p12 }
  0x20   :  { %p310_p1 = pnand %p309_p0, %p303_p11 }
  0x22   :  { %313 = shalt.err (!%p310_p1)
}
  0x23   :  { %36 = dma.hbm_to_vmem [thread:$0]  %s451_s1, 1024, %s31_s27, [#allocation6], %s367_s22, %s367_s22, %s368_s23  }
  0x24   :  { %358 = dma.done.wait [#allocation3], 128  }
  0x25   :  { %359 = vsyncadd [#allocation3], 4294967168 }
  0x26   :  { %360 = dma.done.wait [#allocation6], 1024  }
  0x27   :  { %361 = vsyncadd [#allocation6], 4294966272  ;;  %v370_v0 = vmov 0.0   ;;  %vm371_vm0 = vmmov 0   ;;  %v261_v1 = vld [vmem:[#allocation5] sm:$0xff]   ;;  %v262_v2 = vld [vmem:[#allocation5 + $0x8] sm:$0xff]  }
  0x28   :  { %233 = vmatprep.subr.bf16.mxu0 %v370_v0  ;;  %48 = vst [vmem:[#allocation7] sm:$0x1] %v370_v0  ;;  %49 = vst [vmem:[#allocation8] sm:$0x1] %v370_v0  ;;  %249 = vmatprep.mubr.msk.bf16.mxu0 %vm371_vm0, %v370_v0  ;;  %v263_v3 = vld [vmem:[#allocation5 + $0x10] sm:$0xff]   ;;  %v264_v4 = vld [vmem:[#allocation5 + $0x18] sm:$0xff]  }
  0x29   :  { %234 = vmatpush3.bf16.msra.mxu0 %v261_v1  ;;  %v265_v5 = vld [vmem:[#allocation5 + $0x20] sm:$0xff]   ;;  %v266_v6 = vld [vmem:[#allocation5 + $0x28] sm:$0xff]   ;;  %v267_v7 = vld [vmem:[#allocation5 + $0x30] sm:$0xff]   ;;  %s372_s1 = smov [#allocation7]   ;;  %s373_s11 = smov [#allocation8]  }
  0x2a   :  { %235 = vmatprep.subr.bf16.mxu0 %v370_v0  ;;  %v268_v8 = vld [vmem:[#allocation5 + $0x38] sm:$0xff]   ;;  %s191_s10 = sshll.u32 %s372_s1, 4  ;;  %s201_s12 = sshll.u32 %s373_s11, 4  ;;  %s192_s10 = int_to_ptr.vmem [resolvable:$true] %s191_s10  ;;  %s418_s12 = int_to_ptr.vmem [resolvable:$true] %s201_s12 }
  0x2b   :  { %v269_v9 = vld [vmem:[#allocation2] sm:$0xff]   ;;  %s314_s13 = scalar_lea.vmem %s192_s10, 16  ;;  %s318_s14 = scalar_lea.vmem %s192_s10, 32 }
  0x2c   :  { %p315_p2 = scmp.ne.s32.totalorder %s192_s10, %s314_s13  ;;  %p319_p3 = scmp.lt.s32.totalorder %s192_s10, %s192_s10 }
  0x2d   :  { %236 = vmatpush3.bf16.msra.mxu0 %v262_v2  ;;  %p320_p4 = scmp.lt.s32.totalorder %s318_s14, %s314_s13 }
  0x2e   :  { %237 = vmatprep.subr.bf16.mxu0 %v370_v0 }
  0x2f   :  { %v163_v27 = vld [vmem:[#allocation7] sm:$0x1]  ;;  %v173_v30 = vld [vmem:[#allocation8] sm:$0x1]  ;;  %p321_p5 = por %p320_p4, %p319_p3 }
  0x31   :  { %238 = vmatpush3.bf16.msra.mxu0 %v263_v3  ;;  %p322_p6 = pnand %p321_p5, %p315_p2 }
  0x32   :  { %239 = vmatprep.subr.bf16.mxu0 %v370_v0 }
  0x35   :  { %240 = vmatpush3.bf16.msra.mxu0 %v264_v4 }
  0x36   :  { %241 = vmatprep.subr.bf16.mxu0 %v370_v0 }
  0x39   :  { %242 = vmatpush3.bf16.msra.mxu0 %v265_v5 }
  0x3a   :  { %243 = vmatprep.subr.bf16.mxu0 %v370_v0 }
  0x3d   :  { %244 = vmatpush3.bf16.msra.mxu0 %v266_v6 }
  0x3e   :  { %245 = vmatprep.subr.bf16.mxu0 %v370_v0 }
  0x41   :  { %246 = vmatpush3.bf16.msra.mxu0 %v267_v7 }
  0x42   :  { %247 = vmatprep.subr.bf16.mxu0 %v370_v0 }
  0x45   :  { %248 = vmatpush3.bf16.msra.mxu0 %v268_v8 }
  0x48   :  { %250 = vmatmul.mubr.bf16.vlgmr.msra.gmra.mrb[0].mxu0 %v269_v9 }
 0x11b   :  { %v156_v10 = vpop.f32.mrb[0].mxu0 }
 0x11c   :  { %v251_v11 = vpop.f32.mrb[1].mxu0  ;;  %v174_v13 = vmul.f32 %v156_v10, %v156_v10 }
 0x11d   :  { %v159_v12 = vpop.f32.mrb[2].mxu0 }
 0x11e   :  { %v164_v14 = vadd.f32 %v159_v12, %v156_v10  ;;  %v175_v15 = vmul.f32 %v159_v12, %v159_v12  ;;  %v252_v16 = vpop.f32.mrb[3].mxu0 }
 0x120   :  { %v165_v17 = vrot.slane %v164_v14, 4  ;;  %v176_v18 = vadd.f32 %v175_v15, %v174_v13 }
 0x122   :  { %v166_v19 = vadd.f32 %v165_v17, %v164_v14  ;;  %v177_v20 = vrot.slane %v176_v18, 4 }
 0x124   :  { %v167_v21 = vrot.slane %v166_v19, 2  ;;  %v178_v22 = vadd.f32 %v177_v20, %v176_v18 }
 0x126   :  { %v168_v23 = vadd.f32 %v167_v21, %v166_v19  ;;  %v179_v24 = vrot.slane %v178_v22, 2 }
 0x128   :  { %v169_v25 = vrot.slane %v168_v23, 1  ;;  %v180_v26 = vadd.f32 %v179_v24, %v178_v22 }
 0x12a   :  { %v170_v28 = vadd.f32 %v169_v25, %v168_v23  ;;  %v181_v29 = vrot.slane %v180_v26, 1 }
 0x12c   :  { %v171_v31 = vadd.f32 %v170_v28, %v163_v27  ;;  %v182_v32 = vadd.f32 %v181_v29, %v180_v26 }
 0x12e   :  { %172 = vst [vmem:[#allocation7] sm:$0x1] %v171_v31  ;;  %v183_v33 = vadd.f32 %v182_v32, %v173_v30 }
 0x12f   :  { %325 = shalt.err (!%p322_p6)
}
 0x130   :  { %s326_s17 = scalar_lea.hbm %s452_s2, 16 }
 0x131   :  { %p327_p7 = scmp.ne.s32.totalorder %s452_s2, %s326_s17  ;;  %p330_p8 = scmp.lt.u32.totalorder %s326_s17, %s452_s2 }
 0x133   :  { %p332_p9 = pnand %p330_p8, %p327_p7 }
 0x135   :  { %335 = shalt.err (!%p332_p9)
}
 0x136   :  { %194 = dma.vmem_to_hbm [thread:$0]  %s192_s10, 16, %s452_s2, [#allocation4]   ;;  %184 = vst [vmem:[#allocation8] sm:$0x1] %v183_v33 }
 0x137   :  { %s336_s24 = scalar_lea.vmem %s418_s12, 16  ;;  %s340_s25 = scalar_lea.vmem %s418_s12, 32 }
 0x138   :  { %p337_p10 = scmp.ne.s32.totalorder %s418_s12, %s336_s24  ;;  %p341_p11 = scmp.lt.s32.totalorder %s418_s12, %s418_s12 }
 0x139   :  { %p342_p12 = scmp.lt.s32.totalorder %s340_s25, %s336_s24 }
 0x13b   :  { %p343_p13 = por %p342_p12, %p341_p11 }
 0x13d   :  { %p344_p0 = pnand %p343_p13, %p337_p10 }
 0x13f   :  { %347 = shalt.err (!%p344_p0)
}
 0x140   :  { %s348_s28 = scalar_lea.hbm %s453_s3, 16 }
 0x141   :  { %p349_p1 = scmp.ne.s32.totalorder %s453_s3, %s348_s28  ;;  %p352_p2 = scmp.lt.u32.totalorder %s348_s28, %s453_s3 }
 0x143   :  { %p354_p3 = pnand %p352_p2, %p349_p1 }
 0x145   :  { %357 = shalt.err (!%p354_p3)
}
 0x146   :  { %204 = dma.vmem_to_hbm [thread:$0]  %s418_s12, 16, %s453_s3, [#allocation9]  }
 0x147   :  { %362 = dma.done.wait [#allocation4], 16  }
 0x148   :  { %363 = vsyncadd [#allocation4], 4294967280 }
 0x149   :  { %364 = dma.done.wait [#allocation9], 16  }
 0x14a   :  { %365 = vsyncadd [#allocation9], 4294967280 }
 0x14b   :  { %211 = vsyncpa [#allocation3], 1 }
 0x14c   :  { %212 = vsyncpa [#allocation6], 1 }
 0x14d   :  { %213 = vsyncpa [#allocation4], 1 }
 0x14e   :  { %214 = vsyncpa [#allocation9], 1 }

</bundles_post_ra>
